<compile_context>
chip_gen: v6e
topology: v6e:2x2x1
jax: 0.10.0
libtpu: 0.0.40
codegen_flags: <defaults>
</compile_context>

<pallas_src>
import functools

import jax
import jax.numpy as jnp
from jax.experimental import pallas as pl
from jax.experimental.pallas import tpu as pltpu

EPS = 1e-5
DIVIDER = 4


# ----------------------------------------------------------------------------
# Kernels
# ----------------------------------------------------------------------------
def _gbn_single_kernel(std_ref, bstd_ref, x_ref, o_ref, *, inv_n, hw_valid):
    """One grid step = one ghost batch x one channel tile (stats + normalize)."""
    xg = x_ref[...].astype(jnp.float32)                      # (ng, tc, hw_pad)
    # Two-pass stats (mean, then centered squares) in f32: avoids the
    # sum / sum-of-squares cancellation when |mean| >> std.
    mean = jnp.sum(xg, axis=(0, 2), keepdims=True) * inv_n   # (1, tc, 1)
    centered = xg - mean
    csq = centered * centered
    if hw_valid != xg.shape[2]:
        # Lane padding: padded columns are zeros -> they contribute nothing to
        # the sum (mean is exact), but (0 - mean)^2 must be masked from var.
        lane = jax.lax.broadcasted_iota(jnp.int32, (1, 1, xg.shape[2]), 2)
        csq = jnp.where(lane < hw_valid, csq, 0.0)
    var = jnp.sum(csq, axis=(0, 2), keepdims=True) * inv_n   # biased variance
    # Fold BN + (y + bias) * std into one multiply-add:
    #   out = (x - mean) * rsqrt(var + eps) * std + bias * std
    scale = jax.lax.rsqrt(var + EPS) * std_ref[0]
    o_ref[...] = (centered * scale + bstd_ref[0]).astype(o_ref.dtype)


def _gbn_stats_kernel(std_ref, bstd_ref, x_ref, scale_ref, shift_ref,
                      s1_ref, s2_ref, *, inv_n):
    """Fallback pass A: accumulate per-channel stats over HW chunks."""
    h = pl.program_id(2)

    @pl.when(h == 0)
    def _init():
        s1_ref[...] = jnp.zeros_like(s1_ref)
        s2_ref[...] = jnp.zeros_like(s2_ref)

    xg = x_ref[...].astype(jnp.float32)                      # (ng, tc, hw_blk)
    # One-pass sum / sum-of-squares here (zero padding contributes nothing);
    # slight cancellation risk for huge DC offsets, accumulated in f32.
    s1_ref[...] += jnp.sum(xg, axis=(0, 2), keepdims=True)
    s2_ref[...] += jnp.sum(xg * xg, axis=(0, 2), keepdims=True)

    @pl.when(h == pl.num_programs(2) - 1)
    def _finalize():
        mean = s1_ref[...] * inv_n
        var = jnp.maximum(s2_ref[...] * inv_n - mean * mean, 0.0)
        scale = jax.lax.rsqrt(var + EPS) * std_ref[0]
        scale_ref[...] = scale
        shift_ref[...] = bstd_ref[0] - mean * scale


def _gbn_apply_kernel(scale_ref, shift_ref, x_ref, o_ref):
    """Fallback pass B: per-channel fused multiply-add."""
    o_ref[...] = (x_ref[...].astype(jnp.float32) * scale_ref[...]
                  + shift_ref[...]).astype(o_ref.dtype)


# ----------------------------------------------------------------------------
# Sizing helpers
# ----------------------------------------------------------------------------
def _round_up(x, m):
    return ((x + m - 1) // m) * m


def _vmem_budget():
    """(effective bytes target per grid step, vmem_limit_bytes) per generation.

    The 'effective' target already accounts for 2x in + 2x out double buffers
    and ~2 f32 temporaries of the block (see eff_per_elem below).
    """
    kind = ""
    try:
        kind = jax.devices()[0].device_kind.lower()
    except Exception:
        pass
    if "v7" in kind:
        # v7x: 64 MiB physical VMEM per TensorCore.
        return 36 * 1024 * 1024, 48 * 1024 * 1024
    # v5e / v6e: 128 MiB physical VMEM; raise the 16/32 MiB scoped default.
    return 72 * 1024 * 1024, 96 * 1024 * 1024


def _channel_tiles(C):
    """Sublane-dense (multiple of 8) divisors of C; fall back to C itself."""
    cands = [tc for tc in range(8, C + 1, 8) if C % tc == 0]
    return cands if cands else [C]


# ----------------------------------------------------------------------------
# Wrapper
# ----------------------------------------------------------------------------
def ghost_batch_norm_2d(x, bias, std, divider=DIVIDER,
                        force_two_pass=False, _force_hw_block=None):
    """x: (N, C, H, W) NCHW like PyTorch; bias, std: shape (1,). Same shape/dtype out."""
    N, C, H, W = x.shape
    assert N % divider == 0, "batch must be divisible by `divider`"
    ng = N // divider
    hw = H * W
    itemsize = jnp.dtype(x.dtype).itemsize

    target_eff, vmem_limit = _vmem_budget()
    # Per-element effective VMEM cost: 2x in + 2x out (double buffering) plus
    # ~2 f32 temporaries (upcast + centered/squared copy) — review item 2.
    eff_per_elem = 4 * itemsize + 8

    cands = _channel_tiles(C)
    tc_min = min(cands)

    # Does the smallest single-pass block fit (conservatively assume lane pad)?
    single_fits = ng * tc_min * _round_up(hw, 128) * eff_per_elem <= target_eff
    two_pass = force_two_pass or not single_fits

    # Lane-density handling (item 5): the fallback needs a 128-multiple HW to
    # chunk it; the single-pass path only pads genuinely lane-sparse small maps
    # (padding a big ragged map costs a full extra HBM pass for little gain).
    if two_pass:
        pad128 = hw % 128 != 0
    else:
        pad128 = (hw % 128 != 0) and (hw < 512)
    hw_pad = _round_up(hw, 128) if pad128 else hw

    x3 = x.reshape(N, C, hw)
    if pad128:
        x3 = jnp.pad(x3, ((0, 0), (0, 0), (0, hw_pad - hw)))

    # Hoist the scalar math: the kernels only need std and bias*std (item 7).
    stdf = std.astype(jnp.float32)
    bstd = (bias * std).astype(jnp.float32)

    if not two_pass:
        # ------------------------- single-pass path -------------------------
        tc = max(t for t in cands
                 if ng * t * hw_pad * eff_per_elem <= target_eff)
        # Keep >= 2 grid steps so v7x's second TensorCore has work (item 3).
        if divider * (C // tc) < 2:
            smaller = [t for t in cands if t < tc]
            if smaller:
                tc = max(smaller)

        kernel = functools.partial(_gbn_single_kernel,
                                   inv_n=1.0 / (ng * hw), hw_valid=hw)
        out3 = pl.pallas_call(
            kernel,
            out_shape=jax.ShapeDtypeStruct((N, C, hw_pad), x.dtype),
            grid_spec=pltpu.PrefetchScalarGridSpec(
                num_scalar_prefetch=0,
                grid=(divider, C // tc),
                in_specs=[
                    pl.BlockSpec(memory_space=pltpu.MemorySpace.SMEM),  # std
                    pl.BlockSpec(memory_space=pltpu.MemorySpace.SMEM),  # bias*std
                    pl.BlockSpec((ng, tc, hw_pad), lambda g, c: (g, c, 0)),
                ],
                out_specs=pl.BlockSpec((ng, tc, hw_pad), lambda g, c: (g, c, 0)),
            ),
            compiler_params=pltpu.CompilerParams(
                dimension_semantics=("parallel", "parallel"),
                vmem_limit_bytes=vmem_limit,
            ),
        )(stdf, bstd, x3)
    else:
        # --------------------- two-pass (HW split) fallback ------------------
        # Channel tile sized against the smallest (128-lane) HW chunk.
        tc_fit = [t for t in cands if ng * t * 128 * eff_per_elem <= target_eff]
        tc = max(tc_fit) if tc_fit else tc_min

        if _force_hw_block is not None:  # test hook
            assert _force_hw_block % 128 == 0 and hw_pad % _force_hw_block == 0
            hw_blk = _force_hw_block
        else:
            n128 = hw_pad // 128
            hw_cands = [128 * d for d in range(1, n128 + 1) if n128 % d == 0]
            fitting = [h for h in hw_cands
                       if ng * tc * h * eff_per_elem <= target_eff]
            hw_blk = max(fitting) if fitting else 128

        grid = (divider, C // tc, hw_pad // hw_blk)
        ss_shape = jax.ShapeDtypeStruct((divider, C, 1), jnp.float32)

        # Pass A: per-(ghost, channel) folded scale/shift.
        scale, shift = pl.pallas_call(
            functools.partial(_gbn_stats_kernel, inv_n=1.0 / (ng * hw)),
            out_shape=(ss_shape, ss_shape),
            grid_spec=pltpu.PrefetchScalarGridSpec(
                num_scalar_prefetch=0,
                grid=grid,
                in_specs=[
                    pl.BlockSpec(memory_space=pltpu.MemorySpace.SMEM),  # std
                    pl.BlockSpec(memory_space=pltpu.MemorySpace.SMEM),  # bias*std
                    pl.BlockSpec((ng, tc, hw_blk), lambda g, c, h: (g, c, h)),
                ],
                out_specs=[
                    pl.BlockSpec((1, tc, 1), lambda g, c, h: (g, c, 0)),
                    pl.BlockSpec((1, tc, 1), lambda g, c, h: (g, c, 0)),
                ],
                scratch_shapes=[pltpu.VMEM((1, tc, 1), jnp.float32),
                                pltpu.VMEM((1, tc, 1), jnp.float32)],
            ),
            compiler_params=pltpu.CompilerParams(
                dimension_semantics=("parallel", "parallel", "arbitrary"),
                vmem_limit_bytes=vmem_limit,
            ),
        )(stdf, bstd, x3)

        # Pass B: elementwise apply (all axes parallel).
        out3 = pl.pallas_call(
            _gbn_apply_kernel,
            out_shape=jax.ShapeDtypeStruct((N, C, hw_pad), x.dtype),
            grid_spec=pltpu.PrefetchScalarGridSpec(
                num_scalar_prefetch=0,
                grid=grid,
                in_specs=[
                    pl.BlockSpec((1, tc, 1), lambda g, c, h: (g, c, 0)),
                    pl.BlockSpec((1, tc, 1), lambda g, c, h: (g, c, 0)),
                    pl.BlockSpec((ng, tc, hw_blk), lambda g, c, h: (g, c, h)),
                ],
                out_specs=pl.BlockSpec((ng, tc, hw_blk), lambda g, c, h: (g, c, h)),
            ),
            compiler_params=pltpu.CompilerParams(
                dimension_semantics=("parallel", "parallel", "parallel"),
                vmem_limit_bytes=vmem_limit,
            ),
        )(scale, shift, x3)

    if pad128:
        out3 = out3[..., :hw]
    return out3.reshape(N, C, H, W)


# ----------------------------------------------------------------------------
# Reference + test
# ----------------------------------------------------------------------------
def _reference(x, bias, std, divider=DIVIDER):
    N, C, H, W = x.shape
    xg = x.reshape(divider, N // divider, C, H, W).astype(jnp.float32)
    mean = jnp.mean(xg, axis=(1, 3, 4), keepdims=True)
    var = jnp.mean((xg - mean) ** 2, axis=(1, 3, 4), keepdims=True)
    y = (xg - mean) / jnp.sqrt(var + EPS)
    y = (y + bias[0]) * std[0]
    return y.reshape(N, C, H, W).astype(x.dtype)


if __name__ == "__main__":
    key = jax.random.PRNGKey(0)

    # Deterministic learnable params; non-default values exercise the folded
    # (normalized + bias) * std path (module init is zeros(1)/ones(1)).
    bias = jnp.full((1,), 0.25, dtype=jnp.float32)
    std = jnp.full((1,), 1.5, dtype=jnp.float32)

    # 1) main single-pass path (lane-dense hw = 256)
    N, C, H, W = 8, 4, 16, 16
    x = jax.random.normal(key, (N, C, H, W), dtype=jnp.float32)
    ref = _reference(x, bias, std)
    out = jax.block_until_ready(ghost_batch_norm_2d(x, bias, std))
    assert out.shape == (N, C, H, W)
    assert jnp.allclose(out, ref, atol=2e-5, rtol=2e-5), float(
        jnp.max(jnp.abs(out - ref)))

    # 2) lane-sparse spatial map (7x7 -> padded to 128 lanes, masked variance)
    xs = jax.random.normal(jax.random.PRNGKey(1), (8, 4, 7, 7), dtype=jnp.float32)
    refs = _reference(xs, bias, std)
    outs = jax.block_until_ready(ghost_batch_norm_2d(xs, bias, std))
    assert jnp.allclose(outs, refs, atol=2e-5, rtol=2e-5), float(
        jnp.max(jnp.abs(outs - refs)))

    # 3) two-pass HW-split fallback (forced, 128-wide chunks -> 2 reduction steps)
    out2 = jax.block_until_ready(
        ghost_batch_norm_2d(x, bias, std, force_two_pass=True, _force_hw_block=128))
    assert jnp.allclose(out2, ref, atol=2e-5, rtol=2e-5), float(
        jnp.max(jnp.abs(out2 - ref)))

    print("KERNEL_OK")
</pallas_src>

<mosaic_0001>
module attributes {stable_mosaic.version = 11 : i64} {
  func.func @_gbn_single_kernel(%arg0: i32, %arg1: i32, %arg2: memref<1xf32, #tpu.memory_space<smem>>, %arg3: memref<1xf32, #tpu.memory_space<smem>>, %arg4: memref<2x4x256xf32, #tpu.memory_space<vmem>>, %arg5: memref<2x4x256xf32, #tpu.memory_space<vmem>>) attributes {dimension_semantics = [#tpu.dimension_semantics<parallel>, #tpu.dimension_semantics<parallel>], iteration_bounds = array<i64: 4, 1>, scalar_prefetch = 0 : i64, scratch_operands = 0 : i64, tpu.core_type = #tpu.core_type<tc>, window_params = [{transform_indices = @transform_0, window_bounds = array<i64: 1>}, {transform_indices = @transform_1, window_bounds = array<i64: 1>}, {transform_indices = @transform_2, window_bounds = array<i64: 2, 4, 256>}, {transform_indices = @transform_3, window_bounds = array<i64: 2, 4, 256>}]} {
    %c0 = arith.constant 0 : index
    %c0_0 = arith.constant 0 : index
    %c0_1 = arith.constant 0 : index
    %0 = vector.load %arg4[%c0, %c0_0, %c0_1] : memref<2x4x256xf32, #tpu.memory_space<vmem>>, vector<2x4x256xf32>
    %cst = arith.constant dense<0.000000e+00> : vector<4xf32>
    %1 = vector.multi_reduction <add>, %0, %cst [0, 2] : vector<2x4x256xf32> to vector<4xf32>
    %2 = vector.shape_cast %1 : vector<4xf32> to vector<1x4x1xf32>
    %cst_2 = arith.constant 0.001953125 : f32
    %3 = vector.broadcast %cst_2 : f32 to vector<1x4x1xf32>
    %4 = arith.mulf %2, %3 : vector<1x4x1xf32>
    %5 = vector.broadcast %4 : vector<1x4x1xf32> to vector<2x4x256xf32>
    %6 = arith.subf %0, %5 : vector<2x4x256xf32>
    %7 = arith.mulf %6, %6 : vector<2x4x256xf32>
    %cst_3 = arith.constant dense<0.000000e+00> : vector<4xf32>
    %8 = vector.multi_reduction <add>, %7, %cst_3 [0, 2] : vector<2x4x256xf32> to vector<4xf32>
    %9 = vector.shape_cast %8 : vector<4xf32> to vector<1x4x1xf32>
    %cst_4 = arith.constant 0.001953125 : f32
    %10 = vector.broadcast %cst_4 : f32 to vector<1x4x1xf32>
    %11 = arith.mulf %9, %10 : vector<1x4x1xf32>
    %cst_5 = arith.constant 9.99999974E-6 : f32
    %12 = vector.broadcast %cst_5 : f32 to vector<1x4x1xf32>
    %13 = arith.addf %11, %12 : vector<1x4x1xf32>
    %14 = math.rsqrt %13 : vector<1x4x1xf32>
    %c0_6 = arith.constant 0 : index
    %15 = memref.load %arg2[%c0_6] : memref<1xf32, #tpu.memory_space<smem>>
    %16 = vector.broadcast %15 : f32 to vector<1x4x1xf32>
    %17 = arith.mulf %14, %16 : vector<1x4x1xf32>
    %18 = vector.broadcast %17 : vector<1x4x1xf32> to vector<2x4x256xf32>
    %19 = arith.mulf %6, %18 : vector<2x4x256xf32>
    %c0_7 = arith.constant 0 : index
    %20 = memref.load %arg3[%c0_7] : memref<1xf32, #tpu.memory_space<smem>>
    %21 = vector.broadcast %20 : f32 to vector<2x4x256xf32>
    %22 = arith.addf %19, %21 : vector<2x4x256xf32>
    %c0_8 = arith.constant 0 : index
    %c0_9 = arith.constant 0 : index
    %c0_10 = arith.constant 0 : index
    %23 = vector.load %arg5[%c0_8, %c0_9, %c0_10] : memref<2x4x256xf32, #tpu.memory_space<vmem>>, vector<2x4x256xf32>
    tpu.vector_store %arg5[%c0_8, %c0_9, %c0_10], %22 {strides = array<i32>} : memref<2x4x256xf32, #tpu.memory_space<vmem>>, vector<2x4x256xf32>,
    return
  }
  func.func @transform_0(%arg0: i32, %arg1: i32) -> i32 {
    %c0_i32 = arith.constant 0 : i32
    %c0_i32_0 = arith.constant 0 : i32
    return %c0_i32 : i32
  }
  func.func @transform_1(%arg0: i32, %arg1: i32) -> i32 {
    %c0_i32 = arith.constant 0 : i32
    %c0_i32_0 = arith.constant 0 : i32
    return %c0_i32 : i32
  }
  func.func @transform_2(%arg0: i32, %arg1: i32) -> (i32, i32, i32) {
    %c0_i32 = arith.constant 0 : i32
    %c0_i32_0 = arith.constant 0 : i32
    return %arg0, %arg1, %c0_i32 : i32, i32, i32
  }
  func.func @transform_3(%arg0: i32, %arg1: i32) -> (i32, i32, i32) {
    %c0_i32 = arith.constant 0 : i32
    %c0_i32_0 = arith.constant 0 : i32
    return %arg0, %arg1, %c0_i32 : i32, i32, i32
  }
}

</mosaic_0001>

<bundles_post_ra>
// kernel: tpu_custom_call.1
= control target key start
LH: loop header
LB: loop body
LE: loop exit
PB: predicated region body
PF: predicated region fallthrough
CT: control target
= control target key end

     0   :  { %s777_s0 = inlined_call_operand.<no memory space> [shape: f32[1], index: 0, kind: input, shape index: {}]   ;;  %s778_s1 = inlined_call_operand.<no memory space> [shape: f32[1], index: 1, kind: input, shape index: {}]   ;;  %s779_s2 = inlined_call_operand.hbm [shape: f32[8,4,256], index: 2, kind: input, shape index: {}]   ;;  %s780_s3 = inlined_call_operand.hbm [shape: f32[8,4,256], index: 3, kind: output, shape index: {}]  }
   0x1   :  { %8 = sst [smem:[#allocation2]] %s777_s0 }
   0x2   :  { %9 = sst [smem:[#allocation3]] %s778_s1 }
   0x3   :  { %10 = vsyncpa [#allocation5], 0 }
   0x4   :  { %12 = vsyncpa [#allocation5 + $0x1], 0 }
   0x5   :  { %13 = vsyncpa [#allocation6], 0 }
   0x6   :  { %15 = vsyncpa [#allocation6 + $0x1], 0  ;;  %s621_s16 = smov 0   ;;  %s623_s17 = smov 0  }
   0x7   :  { %s625_s18 = smov 0   ;;  %s627_s19 = smov 0  }
   0x8   :  { %s629_s20 = smov 0   ;;  %s631_s21 = smov 0  }
   0x9 LB: > { %s386_s0 = sadd.s32 4294967295, %s586_s21   ;;  %s387_s1 = sadd.s32 4294967294, %s586_s21   ;;  %s586_s21 = sphi %s631_s21, %s21_s21   ;;  %s582_s20 = sphi %s629_s20, %s790_s20   ;;  %s578_s19 = sphi %s627_s19, %s789_s19   ;;  %s574_s18 = sphi %s625_s18, %s788_s18   ;;  %s570_s17 = sphi %s623_s17, %s787_s17   ;;  %s566_s16 = sphi %s621_s16, %s786_s16  }
   0xa   : > { %s33_s22 = sadd.s32 1, %s582_s20  ;;  %s84_s23 = sadd.s32 1, %s574_s18 }
   0xb   : > { %p35_p0 = scmp.ge.s32.totalorder %s33_s22, 4  ;;  %p91_p1 = scmp.ne.s32.totalorder %s574_s18, %s570_s17 }
   0xc   : > { %p92_p2 = scmp.eq.s32.totalorder %s586_s21, 0  ;;  %p97_p3 = scmp.ne.s32.totalorder %s570_s17, %s566_s16 }
   0xd   : > { %s792_s22 = smov (%p35_p0, %s33_s22), 0  ;;  %p98_p5 = scmp.eq.s32.totalorder %s386_s0, 0 }
   0xe   : > { %p662_p4 = por %p92_p2, %p91_p1  ;;  %s79_s25 = ssub.s32 %s582_s20, %s792_s22 }
   0xf   : > { %p123_p6 = scmp.eq.s32.totalorder %s386_s0, 3  ;;  %p82_p7 = scmp.eq.s32.totalorder %s79_s25, 0 }
  0x10   : > { %p668_p8 = por %p98_p5, %p97_p3  ;;  %p129_p10 = scmp.eq.s32.totalorder %s387_s1, 3 }
  0x11   : > { %p672_p9 = por %p123_p6, %p91_p1  ;;  %p419_p12 = scmp.lt.s32.totalorder %s586_s21, 4 }
  0x12   : > { %s677_s28 = scalar_select %p82_p7, %s574_s18, %s84_s23  }
  0x13   : > { %p679_p11 = por %p129_p10, %p97_p3  ;;  %s155_s30 = sand.u32 1, %s574_s18  }
  0x14   : > { %s390_s4 = sshll.u32 %s155_s30, 4  ;;  %s404_s5 = sshll.u32 %s582_s20, 8 }
  0x15   : > { %s168_s8 = scalar_lea.hbm %s779_s2, %s404_s5  ;;  %s159_s9 = scalar_lea.vmem [#allocation4], %s390_s4 }
  0x16   : > { %s169_s10 = sshll.u32 %s159_s9, 4  ;;  %p691_p13 = pnand %p419_p12, %p662_p4  ;;  %s170_s10 = int_to_ptr.vmem [resolvable:$true] %s169_s10 }
  0x17   : > { %p394_p0 = scmp.ge.s32.totalorder %s586_s21, 1  ;;  %s156_s12 = scalar_lea.sflag [#allocation5], %s155_s30 }
  0x18   : > { %p480_p1 = pneg %p691_p13  ;;  %s491_s13 = scalar_lea.vmem %s170_s10, 256 }
  0x19   : > { %p492_p2 = scmp.ne.s32.totalorder %s170_s10, %s491_s13  ;;  %s588_s14 = smov [#allocation4]  }
  0x1a   : > { %s496_s15 = sshll.u32 %s588_s14, 4  ;;  %s497_s15 = int_to_ptr.vmem [resolvable:$false] %s496_s15 }
  0x1b   : > { %p494_p3 = pnand %p492_p2, %p480_p1  ;;  %s498_s0 = scalar_lea.vmem %s497_s15, 512 }
  0x1c   : > { %p499_p6 = scmp.lt.s32.totalorder %s170_s10, %s497_s15  ;;  %p500_p7 = scmp.lt.s32.totalorder %s498_s0, %s491_s13 }
  0x1d   : > { %p495_p5 = pneg %p494_p3 }
  0x1e   : > { %p501_p10 = por %p500_p7, %p499_p6 }
  0x20   : > { %p502_p4 = pnand %p501_p10, %p495_p5 }
  0x22   : > { %505 = shalt.err (!%p502_p4)
}
  0x23   : > { %s589_s1 = smov 128   ;;  %s590_s23 = smov 8  }
  0x24   : > { %414 = dma.hbm_to_vmem [thread:$0]  (!%p691_p13), %s168_s8, 256, %s170_s10, %s156_s12, %s589_s1, %s589_s1, %s590_s23  }
  0x25   : > { %p177_p12 = scmp.lt.s32.totalorder %s586_s21, 5 }
  0x27   : > { %p178_p1 = pnand %p394_p0, %p177_p12 }
  0x28   : > { %s704_s24 = sand.u32 (!%p178_p1), 1, %s570_s17  }
  0x29   : > { %181 = sbr.rel (%p178_p1) target bundleno = 390 (0x186), region = 32  ;;  %s395_s25 = sshll.u32 (!%p178_p1), %s704_s24, 4 }
  0x2a   : > { %s184_s30 = scalar_lea.sflag (!%p178_p1), [#allocation5], %s704_s24  ;;  %s187_s4 = scalar_lea.vmem (!%p178_p1), [#allocation4], %s395_s25 }
  0x2e   : > { %557 = dma.done.wait (%p668_p8), %s184_s30, 256  }
  0x2f   : > { %559 = vsyncadd (%p668_p8), %s184_s30, 4294967040  ;;  %vm220_vm0 = vcmask 1043456   ;;  %v212_v0 = vld [vmem:[%s187_s4] sm:$0xff]  ;;  %v213_v1 = vld [vmem:[%s187_s4 + $0x8] sm:$0xff]  ;;  %v591_v11 = vmov 839922192   ;;  %v235_v13 = vlaneseq }
  0x30   : > { %v216_v2 = vcombine.high %v212_v0, %v212_v0  ;;  %v217_v3 = vcombine.high %v213_v1, %v213_v1  ;;  %v221_v4 = vsel %vm220_vm0, %v212_v0, 0.0  ;;  %v224_v6 = vsel %vm220_vm0, %v213_v1, 0.0  ;;  %s262_s26 = sld [smem:[#allocation2]]  ;;  %s406_s6 = sshll.u32 %s578_s19, 8 }
  0x31   : > { %v233_v12 = vunpack.c.l.s4 %v591_v11  ;;  %v236_v15 = vshrl.u32 %v235_v13, 7  ;;  %s276_s5 = sld [smem:[#allocation3]]  ;;  %s209_s7 = scalar_lea.vmem [#allocation7], %s395_s25 }
  0x32   : > { %v222_v5 = vsel %vm220_vm0, %v216_v2, 0.0  ;;  %v226_v8 = vsel %vm220_vm0, %v217_v3, 0.0  ;;  %s299_s8 = sshll.u32 %s209_s7, 4  ;;  %s728_s11 = scalar_lea.hbm %s780_s3, %s406_s6  ;;  %s730_s8 = int_to_ptr.vmem [resolvable:$true] %s299_s8 }
  0x33   : > { %v223_v7 = vadd.f32 %v222_v5, %v221_v4  ;;  %v234_v14 = vunpack.c.0.s8 %v233_v12  ;;  %s283_s19 = scalar_lea.sflag [#allocation6], %s704_s24  ;;  %s506_s12 = scalar_lea.vmem %s730_s8, 256 }
  0x34   : > { %p507_p8 = scmp.ne.s32.totalorder %s730_s8, %s506_s12  ;;  %s592_s13 = smov [#allocation7]  }
  0x35   : > { %v225_v9 = vadd.f32 %v224_v6, %v223_v7  ;;  %v237_v16 = vsub.s32 %v234_v14, %v236_v15  ;;  %s510_s14 = sshll.u32 %s592_s13, 4  ;;  %s511_s14 = int_to_ptr.vmem [resolvable:$false] %s510_s14 }
  0x36   : > { %v263_v36 = vstv %s262_s26  ;;  %p508_p13 = pnand %p507_p8, %p672_p9  ;;  %s512_s15 = scalar_lea.vmem %s511_s14, 512 }
  0x37   : > { %v227_v10 = vadd.f32 %v226_v8, %v225_v9  ;;  %v277_v40 = vstv %s276_s5  ;;  %p513_p2 = scmp.lt.s32.totalorder %s730_s8, %s511_s14  ;;  %p514_p3 = scmp.lt.s32.totalorder %s512_s15, %s506_s12 }
  0x38   : > { %p509_p0 = pneg %p508_p13 }
  0x39   : > { %228 = vadd.xlane.f32.xlu0 %v227_v10  ;;  %p515_p5 = por %p514_p3, %p513_p2 }
  0x3b   : > { %p516_p6 = pnand %p515_p5, %p509_p0 }
  0xc2   : > { %v229_v17 = vpop.xlane.xlu0 %228 }
  0xc3   : > { %v230_v18 = vmul.f32 0.001953125, %v229_v17 }
  0xc5   : > { %v238_v19 = vrot.slane %v230_v18, %v237_v16 }
  0xc7   : > { %v240_v20 = vsub.f32 %v212_v0, %v238_v19  ;;  %v241_v21 = vsub.f32 %v213_v1, %v238_v19 }
  0xc9   : > { %v242_v22 = vmul.f32 %v240_v20, %v240_v20  ;;  %v243_v23 = vmul.f32 %v241_v21, %v241_v21 }
  0xcb   : > { %v246_v24 = vcombine.high %v242_v22, %v242_v22  ;;  %v247_v25 = vcombine.high %v243_v23, %v243_v23  ;;  %v250_v26 = vsel %vm220_vm0, %v242_v22, 0.0  ;;  %v253_v29 = vsel %vm220_vm0, %v243_v23, 0.0 }
  0xcd   : > { %v251_v27 = vsel %vm220_vm0, %v246_v24, 0.0  ;;  %v255_v31 = vsel %vm220_vm0, %v247_v25, 0.0 }
  0xce   : > { %v252_v28 = vadd.f32 %v251_v27, %v250_v26 }
  0xd0   : > { %v254_v30 = vadd.f32 %v253_v29, %v252_v28 }
  0xd2   : > { %v256_v32 = vadd.f32 %v255_v31, %v254_v30 }
  0xd4   : > { %257 = vadd.xlane.f32.xlu0 %v256_v32 }
 0x15d   : > { %v258_v33 = vpop.xlane.xlu0 %257 }
 0x15e   : > { %v259_v34 = vmul.f32 0.001953125, %v258_v33 }
 0x160   : > { %v260_v35 = vadd.f32 1e-05, %v259_v34 }
 0x162   : > { %476 = vrsqrt.f32 %v260_v35 }
 0x16f   : > { %v477_v37 = vpop.eup %476 }
 0x170   : > { %v264_v38 = vmul.f32 %v477_v37, %v263_v36 }
 0x172   : > { %v272_v39 = vrot.slane %v264_v38, %v237_v16 }
 0x174   : > { %v274_v41 = vmul.f32 %v272_v39, %v240_v20  ;;  %v275_v42 = vmul.f32 %v272_v39, %v241_v21 }
 0x176   : > { %v278_v43 = vadd.f32 %v277_v40, %v274_v41  ;;  %v279_v44 = vadd.f32 %v277_v40, %v275_v42 }
 0x178   : > { %280 = vst [vmem:[%s209_s7] sm:$0xff] %v278_v43  ;;  %281 = vst [vmem:[%s209_s7 + $0x8] sm:$0xff] %v279_v44 }
 0x179   : > { %519 = shalt.err (!%p516_p6)
}
 0x17a   : > { %s520_s0 = scalar_lea.hbm %s728_s11, 256  ;;  %s524_s25 = scalar_lea.hbm %s780_s3, 1024 }
 0x17b   : > { %p521_p7 = scmp.ne.s32.totalorder %s728_s11, %s520_s0  ;;  %p525_p12 = scmp.lt.s32.totalorder %s728_s11, %s780_s3 }
 0x17c   : > { %p526_p1 = scmp.lt.s32.totalorder %s524_s25, %s520_s0 }
 0x17d   : > { %p522_p10 = pnand %p521_p7, %p672_p9 }
 0x17e   : > { %p527_p8 = por %p526_p1, %p525_p12 }
 0x17f   : > { %p523_p4 = pneg %p522_p10 }
 0x181   : > { %p528_p13 = pnand %p527_p8, %p523_p4 }
 0x183   : > { %531 = shalt.err (!%p528_p13)
}
 0x184   : > { %s593_s26 = smov 128   ;;  %s594_s5 = smov 8  }
 0x185   : > { %409 = dma.vmem_to_hbm [thread:$0]  (%p672_p9), %s730_s8, 256, %s728_s11, %s283_s19, %s593_s26, %s593_s26, %s594_s5  }
 0x186 PF: > { %p420_p0 = scmp.ge.s32.totalorder %s586_s21, 2  ;;  %s314_s6 = sand.u32 1, %s566_s16  }
 0x187   : > { %s315_s7 = scalar_lea.sflag [#allocation6], %s314_s6 }
 0x188   : > { %p416_p2 = pnand %p420_p0, %p679_p11 }
 0x18a   : > { %p417_p3 = pneg %p416_p2 }
 0x18c   : > { %561 = dma.done.wait (%p417_p3), %s315_s7, 256  }
 0x18d   : > { %563 = vsyncadd (%p417_p3), %s315_s7, 4294967040  ;;  %s21_s21 = sadd.s32 1, %s586_s21   ;;  %s786_s16 = smov %s570_s17 }
 0x18e   : > { %p18_p5 = scmp.ge.s32.totalorder %s21_s21, 6   ;;  %s787_s17 = smov %s574_s18 }
 0x18f   : > { %s788_s18 = smov %s677_s28  ;;  %s789_s19 = smov %s582_s20 }
 0x190   : > { %s790_s20 = smov %s792_s22  ;;  %20 = sbr.rel (!%p18_p5) target bundleno = 9 (0x9), region = 77 }
 0x195   :  { %320 = vsyncpa [#allocation5], 1 }
 0x196   :  { %322 = vsyncpa [#allocation5 + $0x1], 1 }
 0x197   :  { %323 = vsyncpa [#allocation6], 1 }
 0x198   :  { %325 = vsyncpa [#allocation6 + $0x1], 1 }

</bundles_post_ra>
